<compile_context>
chip_gen: v6e
topology: v6e:2x2x1
jax: 0.10.0
libtpu: 0.0.40
codegen_flags: <defaults>
</compile_context>

<pallas_src>
import jax
import jax.numpy as jnp
from jax.experimental import pallas as pl

# ---- Module hyperparameters (Pendulum-v1) ----
STATE_DIM = 3
ACTION_DIM = 1
MAX_ACTION = 2.0
H1, H2 = 400, 300


def _pad_to(n, m):
    return ((n + m - 1) // m) * m


# ---- Padded (TPU-aligned) sizes ----
S_PAD = _pad_to(STATE_DIM, 8)      # 8  (sublane multiple is enough here)
H1_PAD = _pad_to(H1, 128)          # 512
H2_PAD = _pad_to(H2, 128)          # 384


def actor_kernel(x_ref, w1_ref, b1_ref, w2_ref, b2_ref, w3_ref, b3_ref, o_ref):
    # layer 1: relu(x @ W1 + b1)      [B,8] @ [8,512] on the MXU, f32 accumulate
    h = jnp.dot(x_ref[...], w1_ref[...].astype(jnp.float32),
                preferred_element_type=jnp.float32)
    h = jnp.maximum(h + b1_ref[...], 0.0)
    # layer 2: relu(h @ W2 + b2)      [B,512] @ [512,384]
    h = jnp.dot(h, w2_ref[...].astype(jnp.float32),
                preferred_element_type=jnp.float32)
    h = jnp.maximum(h + b2_ref[...], 0.0)
    # layer 3: single output column -> VPU multiply + lane reduction (no MXU pass)
    z = jnp.sum(h * w3_ref[...].astype(jnp.float32), axis=-1, keepdims=True)
    o_ref[...] = MAX_ACTION * jnp.tanh(z + b3_ref[...])


def prepare_params(params):
    """Pad + cast the parameters ONCE (not per forward call).

    Weights -> bfloat16 (they dominate HBM->VMEM bytes); biases stay float32.
    """
    w1, b1, w2, b2, w3, b3 = params
    w1p = (jnp.zeros((S_PAD, H1_PAD), jnp.float32)
           .at[:STATE_DIM, :H1].set(w1).astype(jnp.bfloat16))
    b1p = jnp.zeros((1, H1_PAD), jnp.float32).at[0, :H1].set(b1)
    w2p = (jnp.zeros((H1_PAD, H2_PAD), jnp.float32)
           .at[:H1, :H2].set(w2).astype(jnp.bfloat16))
    b2p = jnp.zeros((1, H2_PAD), jnp.float32).at[0, :H2].set(b2)
    # layer-3 weight is a single output column; store it as one row for the
    # VPU-reduction formulation of the last layer.
    w3p = (jnp.zeros((1, H2_PAD), jnp.float32)
           .at[0, :H2].set(w3[:, 0]).astype(jnp.bfloat16))
    b3p = jnp.reshape(b3, (1, 1)).astype(jnp.float32)
    return (w1p, b1p, w2p, b2p, w3p, b3p)


def actor_forward(x, padded_params):
    """x: [B, STATE_DIM] float32. Returns [B, ACTION_DIM] float32."""
    w1p, b1p, w2p, b2p, w3p, b3p = padded_params
    B = x.shape[0]
    b_pad = _pad_to(max(B, 1), 8)

    # Only the (tiny) activations get padded per call.
    xp = jax.lax.pad(x.astype(jnp.float32), jnp.array(0.0, jnp.float32),
                     ((0, b_pad - B, 0), (0, S_PAD - STATE_DIM, 0)))

    full = lambda shape: pl.BlockSpec(shape, lambda: tuple(0 for _ in shape))

    out_pad = pl.pallas_call(
        actor_kernel,
        out_shape=jax.ShapeDtypeStruct((b_pad, ACTION_DIM), jnp.float32),
        grid=(),
        in_specs=[
            full((b_pad, S_PAD)),
            full((S_PAD, H1_PAD)), full((1, H1_PAD)),
            full((H1_PAD, H2_PAD)), full((1, H2_PAD)),
            full((1, H2_PAD)), full((1, 1)),
        ],
        out_specs=full((b_pad, ACTION_DIM)),
    )(xp, w1p, b1p, w2p, b2p, w3p, b3p)

    return out_pad[:B, :ACTION_DIM]
    # TODO(synk): for large replay-buffer batches (B >> 8) on v7x, add a batch
    # grid axis with dimension_semantics=("parallel",) so both TensorCores
    # each take half of the rows (weights replicate, ~0.4 MiB per core).


def init_params(key):
    """PyTorch-style nn.Linear default init: U(-1/sqrt(fan_in), 1/sqrt(fan_in))."""
    def linear(k, fan_in, fan_out):
        kw, kb = jax.random.split(k)
        bound = 1.0 / jnp.sqrt(fan_in)
        w = jax.random.uniform(kw, (fan_in, fan_out), jnp.float32, -bound, bound)
        b = jax.random.uniform(kb, (fan_out,), jnp.float32, -bound, bound)
        return w, b

    k1, k2, k3 = jax.random.split(key, 3)
    w1, b1 = linear(k1, STATE_DIM, H1)
    w2, b2 = linear(k2, H1, H2)
    w3, b3 = linear(k3, H2, ACTION_DIM)
    return (w1, b1, w2, b2, w3, b3)


def actor_ref(x, params):
    """Pure-JAX reference (f32, highest matmul precision)."""
    w1, b1, w2, b2, w3, b3 = params
    hi = jax.lax.Precision.HIGHEST
    h = jnp.maximum(jnp.dot(x, w1, precision=hi) + b1, 0.0)
    h = jnp.maximum(jnp.dot(h, w2, precision=hi) + b2, 0.0)
    return MAX_ACTION * jnp.tanh(jnp.dot(h, w3, precision=hi) + b3)


if __name__ == "__main__":
    key = jax.random.PRNGKey(0)
    kparams, kx = jax.random.split(key)
    params = init_params(kparams)
    padded_params = prepare_params(params)   # one-time padding / bf16 cast

    batch = 2
    x = jax.random.normal(kx, (batch, STATE_DIM), jnp.float32)

    fwd = jax.jit(actor_forward)
    out = jax.block_until_ready(fwd(x, padded_params))

    assert out.shape == (batch, ACTION_DIM)

    # Reference with the same bf16-rounded weights (kernel semantics).
    rounded = tuple(p.astype(jnp.bfloat16).astype(jnp.float32) if p.ndim == 2 else p
                    for p in params)
    ref_bf16w = actor_ref(x, rounded)
    assert jnp.allclose(out, ref_bf16w, atol=2e-2, rtol=2e-2), (out, ref_bf16w)

    # Sanity vs the full-f32 PyTorch-equivalent reference (tolerance covers
    # the bf16 weight rounding).
    ref_f32 = actor_ref(x, params)
    assert jnp.allclose(out, ref_f32, atol=6e-2, rtol=6e-2), (out, ref_f32)

    print("KERNEL_OK")
</pallas_src>

<mosaic_0001>
module attributes {stable_mosaic.version = 11 : i64} {
  func.func @actor_kernel(%arg0: memref<8x8xf32, #tpu.memory_space<vmem>>, %arg1: memref<8x512xbf16, #tpu.memory_space<vmem>>, %arg2: memref<1x512xf32, #tpu.memory_space<vmem>>, %arg3: memref<512x384xbf16, #tpu.memory_space<vmem>>, %arg4: memref<1x384xf32, #tpu.memory_space<vmem>>, %arg5: memref<1x384xbf16, #tpu.memory_space<vmem>>, %arg6: memref<1x1xf32, #tpu.memory_space<vmem>>, %arg7: memref<8x1xf32, #tpu.memory_space<vmem>>) attributes {dimension_semantics = [], scalar_prefetch = 0 : i64, scratch_operands = 0 : i64, tpu.core_type = #tpu.core_type<tc>} {
    %c0 = arith.constant 0 : index
    %c0_0 = arith.constant 0 : index
    %0 = vector.load %arg0[%c0, %c0_0] : memref<8x8xf32, #tpu.memory_space<vmem>>, vector<8x8xf32>
    %c0_1 = arith.constant 0 : index
    %c0_2 = arith.constant 0 : index
    %1 = vector.load %arg1[%c0_1, %c0_2] : memref<8x512xbf16, #tpu.memory_space<vmem>>, vector<8x512xbf16>
    %2 = arith.extf %1 : vector<8x512xbf16> to vector<8x512xf32>
    %cst = arith.constant dense<0.000000e+00> : vector<8x512xf32>
    %3 = tpu.matmul %0, %2, %cst {dimension_numbers = #tpu.dot_dimension_numbers<[1], [0], [0], [1], [0, 0, 1, 1], [], []>} : vector<8x8xf32>, vector<8x512xf32>, vector<8x512xf32> -> vector<8x512xf32>
    %c0_3 = arith.constant 0 : index
    %c0_4 = arith.constant 0 : index
    %4 = vector.load %arg2[%c0_3, %c0_4] : memref<1x512xf32, #tpu.memory_space<vmem>>, vector<1x512xf32>
    %5 = vector.broadcast %4 : vector<1x512xf32> to vector<8x512xf32>
    %6 = arith.addf %3, %5 : vector<8x512xf32>
    %cst_5 = arith.constant 0.000000e+00 : f32
    %7 = vector.broadcast %cst_5 : f32 to vector<8x512xf32>
    %8 = arith.maximumf %6, %7 : vector<8x512xf32>
    %c0_6 = arith.constant 0 : index
    %c0_7 = arith.constant 0 : index
    %9 = vector.load %arg3[%c0_6, %c0_7] : memref<512x384xbf16, #tpu.memory_space<vmem>>, vector<512x384xbf16>
    %10 = arith.extf %9 : vector<512x384xbf16> to vector<512x384xf32>
    %cst_8 = arith.constant dense<0.000000e+00> : vector<8x384xf32>
    %11 = tpu.matmul %8, %10, %cst_8 {dimension_numbers = #tpu.dot_dimension_numbers<[1], [0], [0], [1], [0, 0, 1, 1], [], []>} : vector<8x512xf32>, vector<512x384xf32>, vector<8x384xf32> -> vector<8x384xf32>
    %c0_9 = arith.constant 0 : index
    %c0_10 = arith.constant 0 : index
    %12 = vector.load %arg4[%c0_9, %c0_10] : memref<1x384xf32, #tpu.memory_space<vmem>>, vector<1x384xf32>
    %13 = vector.broadcast %12 : vector<1x384xf32> to vector<8x384xf32>
    %14 = arith.addf %11, %13 : vector<8x384xf32>
    %cst_11 = arith.constant 0.000000e+00 : f32
    %15 = vector.broadcast %cst_11 : f32 to vector<8x384xf32>
    %16 = arith.maximumf %14, %15 : vector<8x384xf32>
    %c0_12 = arith.constant 0 : index
    %c0_13 = arith.constant 0 : index
    %17 = vector.load %arg5[%c0_12, %c0_13] : memref<1x384xbf16, #tpu.memory_space<vmem>>, vector<1x384xbf16>
    %18 = arith.extf %17 : vector<1x384xbf16> to vector<1x384xf32>
    %19 = vector.broadcast %18 : vector<1x384xf32> to vector<8x384xf32>
    %20 = arith.mulf %16, %19 : vector<8x384xf32>
    %cst_14 = arith.constant dense<0.000000e+00> : vector<8xf32>
    %21 = vector.multi_reduction <add>, %20, %cst_14 [1] : vector<8x384xf32> to vector<8xf32>
    %22 = vector.shape_cast %21 : vector<8xf32> to vector<8x1xf32>
    %c0_15 = arith.constant 0 : index
    %c0_16 = arith.constant 0 : index
    %23 = vector.load %arg6[%c0_15, %c0_16] : memref<1x1xf32, #tpu.memory_space<vmem>>, vector<1x1xf32>
    %24 = vector.broadcast %23 : vector<1x1xf32> to vector<8x1xf32>
    %25 = arith.addf %22, %24 : vector<8x1xf32>
    %26 = math.tanh %25 : vector<8x1xf32>
    %cst_17 = arith.constant 2.000000e+00 : f32
    %27 = vector.broadcast %cst_17 : f32 to vector<8x1xf32>
    %28 = arith.mulf %27, %26 : vector<8x1xf32>
    %c0_18 = arith.constant 0 : index
    %c0_19 = arith.constant 0 : index
    %29 = vector.load %arg7[%c0_18, %c0_19] : memref<8x1xf32, #tpu.memory_space<vmem>>, vector<8x1xf32>
    tpu.vector_store %arg7[%c0_18, %c0_19], %28 {strides = array<i32>} : memref<8x1xf32, #tpu.memory_space<vmem>>, vector<8x1xf32>,
    return
  }
}

</mosaic_0001>

<bundles_post_ra>
// kernel: actor_forward.1
= control target key start
LH: loop header
LB: loop body
LE: loop exit
PB: predicated region body
PF: predicated region fallthrough
CT: control target
= control target key end

     0   :  { %s1141_s0 = inlined_call_operand.vmem [shape: f32[8,8], index: 0, kind: input, shape index: {}]   ;;  %s1142_s1 = inlined_call_operand.hbm [shape: bf16[8,512], index: 1, kind: input, shape index: {}]   ;;  %s1143_s2 = inlined_call_operand.vmem [shape: f32[1,512], index: 2, kind: input, shape index: {}]   ;;  %s1144_s3 = inlined_call_operand.hbm [shape: bf16[512,384], index: 3, kind: input, shape index: {}]   ;;  %s1145_s4 = inlined_call_operand.vmem [shape: f32[1,384], index: 4, kind: input, shape index: {}]   ;;  %s1146_s5 = inlined_call_operand.vmem [shape: bf16[1,384], index: 5, kind: input, shape index: {}]   ;;  %s1147_s6 = inlined_call_operand.<no memory space> [shape: f32[1,1], index: 6, kind: input, shape index: {}]   ;;  %s1148_s7 = inlined_call_operand.vmem [shape: f32[8,1], index: 7, kind: output, shape index: {}]  }
   0x1   :  { %v12_v0 = vstv %s1147_s6 }
   0x2   :  { %13 = vst [vmem:[#allocation2] sm:$0x1] %v12_v0 }
   0x3   :  { %14 = vsyncpa [#allocation4], 0 }
   0x4   :  { %15 = vsyncpa [#allocation6], 0  ;;  %s1034_s26 = smov [#allocation3]   ;;  %s1035_s28 = smov [#allocation5]  }
   0x5   :  { %s24_s27 = sshll.u32 %s1034_s26, 4  ;;  %s35_s29 = sshll.u32 %s1035_s28, 4  ;;  %s25_s27 = int_to_ptr.vmem [resolvable:$true] %s24_s27  ;;  %s36_s29 = int_to_ptr.vmem [resolvable:$true] %s35_s29 }
   0x6   :  { %s998_s30 = scalar_lea.vmem %s25_s27, 256  ;;  %p1003_p1 = scmp.lt.s32.totalorder %s25_s27, %s25_s27 }
   0x7   :  { %p999_p0 = scmp.ne.s32.totalorder %s25_s27, %s998_s30  ;;  %p1004_p2 = scmp.lt.s32.totalorder %s998_s30, %s998_s30 }
   0x9   :  { %p1005_p3 = por %p1004_p2, %p1003_p1 }
   0xb   :  { %p1006_p4 = pnand %p1005_p3, %p999_p0 }
   0xd   :  { %1009 = shalt.err (!%p1006_p4)
}
   0xe   :  { %27 = dma.hbm_to_vmem [thread:$0]  %s1142_s1, 256, %s25_s27, [#allocation4]  }
   0xf   :  { %s1018_s6 = scalar_lea.vmem %s36_s29, 12288  ;;  %p1023_p6 = scmp.lt.s32.totalorder %s36_s29, %s36_s29 }
  0x10   :  { %p1019_p5 = scmp.ne.s32.totalorder %s36_s29, %s1018_s6  ;;  %p1024_p7 = scmp.lt.s32.totalorder %s1018_s6, %s1018_s6 }
  0x12   :  { %p1025_p8 = por %p1024_p7, %p1023_p6 }
  0x14   :  { %p1026_p9 = pnand %p1025_p8, %p1019_p5 }
  0x16   :  { %1029 = shalt.err (!%p1026_p9)
}
  0x17   :  { %s1036_s10 = smov 192   ;;  %s1037_s11 = smov 12  }
  0x18   :  { %41 = dma.hbm_to_vmem [thread:$0]  %s1144_s3, 12288, %s36_s29, [#allocation6], %s1036_s10, %s1036_s10, %s1037_s11  }
  0x19   :  { %1030 = dma.done.wait [#allocation4], 256  }
  0x1a   :  { %1031 = vsyncadd [#allocation4], 4294967040 }
  0x1b   :  { %1032 = dma.done.wait [#allocation6], 12288  }
  0x1c   :  { %1033 = vsyncadd [#allocation6], 4294955008  ;;  %v1038_v1 = vmov 0.0   ;;  %v55_v2 = vld [vmem:[#allocation3] sm:$0xff]  ;;  %v56_v3 = vld [vmem:[#allocation3 + $0x8] sm:$0xff]  ;;  %vm83_vm0 = vcmask 64512  }
  0x1d   :  { %151 = vmatprep.mubr.f32.mxu0 %v1038_v1  ;;  %222 = vmatprep.mubr.f32.mxu1 %v1038_v1  ;;  %v58_v4 = vunpack.c.h.bf16 %v55_v2  ;;  %v60_v5 = vunpack.c.h.bf16 %v56_v3  ;;  %v57_v6 = vunpack.c.l.bf16 %v55_v2  ;;  %v59_v7 = vunpack.c.l.bf16 %v56_v3  ;;  %v263_v8 = vld [vmem:[#allocation5 + $0xb4] sm:$0xff]  ;;  %v261_v10 = vld [vmem:[#allocation5 + $0xa8] sm:$0xff]  ;;  %v259_v17 = vld [vmem:[#allocation5 + $0x9c] sm:$0xff] }
  0x1e   :  { %v327_v9 = vld [vmem:[#allocation5 + $0x234] sm:$0xff]  ;;  %v407_v12 = vunpack.c.h.bf16 %v263_v8  ;;  %v325_v14 = vld [vmem:[#allocation5 + $0x228] sm:$0xff]  ;;  %v406_v15 = vunpack.c.l.bf16 %v263_v8  ;;  %v323_v18 = vld [vmem:[#allocation5 + $0x21c] sm:$0xff]  ;;  %v404_v19 = vunpack.c.h.bf16 %v261_v10  ;;  %v403_v21 = vunpack.c.l.bf16 %v261_v10 }
  0x1f   :  { %v54_v11 = vld [vmem:[%s1141_s0] sm:$0xff]  ;;  %v503_v13 = vunpack.c.h.bf16 %v327_v9  ;;  %117 = vmatprep.subr.mxu0 %v58_v4  ;;  %188 = vmatprep.subr.mxu1 %v60_v5  ;;  %v502_v16 = vunpack.c.l.bf16 %v327_v9  ;;  %v500_v20 = vunpack.c.h.bf16 %v325_v14  ;;  %v499_v22 = vunpack.c.l.bf16 %v325_v14  ;;  %v255_v29 = vld [vmem:[#allocation5 + $0x84] sm:$0xff]  ;;  %v253_v35 = vld [vmem:[#allocation5 + $0x78] sm:$0xff] }
  0x20   :  { %118 = vmatpush1.msra.mxu0 %v57_v6  ;;  %189 = vmatpush1.msra.mxu1 %v59_v7  ;;  %v257_v23 = vld [vmem:[#allocation5 + $0x90] sm:$0xff]  ;;  %v401_v25 = vunpack.c.h.bf16 %v259_v17  ;;  %v497_v26 = vunpack.c.h.bf16 %v323_v18  ;;  %v400_v27 = vunpack.c.l.bf16 %v259_v17  ;;  %v496_v28 = vunpack.c.l.bf16 %v323_v18  ;;  %v319_v30 = vld [vmem:[#allocation5 + $0x204] sm:$0xff]  ;;  %v317_v36 = vld [vmem:[#allocation5 + $0x1f8] sm:$0xff] }
  0x21   :  { %910 = vmatmul.mubr.msk.f32.vlgmr.msra.gmra.mxu0 %vm83_vm0, %v54_v11  ;;  %911 = vmatmul.mubr.msk.f32.vlgmr.msra.gmra.mxu1 %vm83_vm0, %v54_v11  ;;  %v321_v24 = vld [vmem:[#allocation5 + $0x210] sm:$0xff]  ;;  %v398_v31 = vunpack.c.h.bf16 %v257_v23  ;;  %v397_v33 = vunpack.c.l.bf16 %v257_v23  ;;  %v395_v37 = vunpack.c.h.bf16 %v255_v29  ;;  %v491_v38 = vunpack.c.h.bf16 %v319_v30  ;;  %v249_v47 = vld [vmem:[#allocation5 + $0x60] sm:$0xff]  ;;  %v245_v59 = vld [vmem:[#allocation5 + $0x48] sm:$0xff] }
  0x22   :  { %570 = vmatprep.subr.mxu0 %v407_v12  ;;  %641 = vmatprep.subr.mxu1 %v503_v13  ;;  %v494_v32 = vunpack.c.h.bf16 %v321_v24  ;;  %v493_v34 = vunpack.c.l.bf16 %v321_v24  ;;  %v394_v39 = vunpack.c.l.bf16 %v255_v29  ;;  %v490_v40 = vunpack.c.l.bf16 %v319_v30  ;;  %v251_v41 = vld [vmem:[#allocation5 + $0x6c] sm:$0xff]  ;;  %v313_v48 = vld [vmem:[#allocation5 + $0x1e0] sm:$0xff]  ;;  %v247_v53 = vld [vmem:[#allocation5 + $0x54] sm:$0xff] }
  0x23   :  { %571 = vmatpush1.msra.mxu0 %v406_v15  ;;  %642 = vmatpush1.msra.mxu1 %v502_v16  ;;  %v315_v42 = vld [vmem:[#allocation5 + $0x1ec] sm:$0xff]  ;;  %v392_v43 = vunpack.c.h.bf16 %v253_v35  ;;  %v488_v44 = vunpack.c.h.bf16 %v317_v36  ;;  %v391_v45 = vunpack.c.l.bf16 %v253_v35  ;;  %v487_v46 = vunpack.c.l.bf16 %v317_v36  ;;  %v311_v54 = vld [vmem:[#allocation5 + $0x1d4] sm:$0xff]  ;;  %v243_v1 = vld [vmem:[#allocation5 + $0x3c] sm:$0xff] }
  0x24   :  { %572 = vmatprep.subr.mxu0 %v404_v19  ;;  %643 = vmatprep.subr.mxu1 %v500_v20  ;;  %v389_v49 = vunpack.c.h.bf16 %v251_v41  ;;  %v485_v50 = vunpack.c.h.bf16 %v315_v42  ;;  %v388_v51 = vunpack.c.l.bf16 %v251_v41  ;;  %v484_v52 = vunpack.c.l.bf16 %v315_v42  ;;  %v309_v60 = vld [vmem:[#allocation5 + $0x1c8] sm:$0xff]  ;;  %v307_v2 = vld [vmem:[#allocation5 + $0x1bc] sm:$0xff]  ;;  %v241_v7 = vld [vmem:[#allocation5 + $0x30] sm:$0xff] }
  0x25   :  { %573 = vmatpush1.msra.mxu0 %v403_v21  ;;  %644 = vmatpush1.msra.mxu1 %v499_v22  ;;  %v386_v55 = vunpack.c.h.bf16 %v249_v47  ;;  %v482_v56 = vunpack.c.h.bf16 %v313_v48  ;;  %v385_v57 = vunpack.c.l.bf16 %v249_v47  ;;  %v481_v58 = vunpack.c.l.bf16 %v313_v48  ;;  %v305_v8 = vld [vmem:[#allocation5 + $0x1b0] sm:$0xff]  ;;  %v239_v13 = vld [vmem:[#allocation5 + $0x24] sm:$0xff]  ;;  %v237_v19 = vld [vmem:[#allocation5 + $0x18] sm:$0xff] }
  0x26   :  { %574 = vmatprep.subr.mxu0 %v401_v25  ;;  %645 = vmatprep.subr.mxu1 %v497_v26  ;;  %v383_v61 = vunpack.c.h.bf16 %v247_v53  ;;  %v479_v62 = vunpack.c.h.bf16 %v311_v54  ;;  %v382_v63 = vunpack.c.l.bf16 %v247_v53  ;;  %v478_v0 = vunpack.c.l.bf16 %v311_v54  ;;  %v303_v14 = vld [vmem:[#allocation5 + $0x1a4] sm:$0xff]  ;;  %v301_v20 = vld [vmem:[#allocation5 + $0x198] sm:$0xff]  ;;  %v235_v25 = vld [vmem:[#allocation5 + $0xc] sm:$0xff] }
  0x27   :  { %575 = vmatpush1.msra.mxu0 %v400_v27  ;;  %646 = vmatpush1.msra.mxu1 %v496_v28  ;;  %v380_v3 = vunpack.c.h.bf16 %v245_v59  ;;  %v476_v4 = vunpack.c.h.bf16 %v309_v60  ;;  %v379_v5 = vunpack.c.l.bf16 %v245_v59  ;;  %v475_v6 = vunpack.c.l.bf16 %v309_v60  ;;  %v299_v26 = vld [vmem:[#allocation5 + $0x18c] sm:$0xff] }
  0x28   :  { %576 = vmatprep.subr.mxu0 %v398_v31  ;;  %647 = vmatprep.subr.mxu1 %v494_v32  ;;  %v377_v9 = vunpack.c.h.bf16 %v243_v1  ;;  %v473_v10 = vunpack.c.h.bf16 %v307_v2  ;;  %v376_v11 = vunpack.c.l.bf16 %v243_v1  ;;  %v472_v12 = vunpack.c.l.bf16 %v307_v2  ;;  %v233_v31 = vld [vmem:[#allocation5] sm:$0xff] }
  0x29   :  { %577 = vmatpush1.msra.mxu0 %v397_v33  ;;  %648 = vmatpush1.msra.mxu1 %v493_v34  ;;  %v374_v15 = vunpack.c.h.bf16 %v241_v7  ;;  %v470_v16 = vunpack.c.h.bf16 %v305_v8  ;;  %v373_v17 = vunpack.c.l.bf16 %v241_v7  ;;  %v469_v18 = vunpack.c.l.bf16 %v305_v8  ;;  %v297_v32 = vld [vmem:[#allocation5 + $0x180] sm:$0xff] }
  0x2a   :  { %578 = vmatprep.subr.mxu0 %v395_v37  ;;  %649 = vmatprep.subr.mxu1 %v491_v38  ;;  %v371_v21 = vunpack.c.h.bf16 %v239_v13  ;;  %v467_v22 = vunpack.c.h.bf16 %v303_v14  ;;  %v370_v23 = vunpack.c.l.bf16 %v239_v13  ;;  %v466_v24 = vunpack.c.l.bf16 %v303_v14  ;;  %v295_v37 = vld [vmem:[#allocation5 + $0x174] sm:$0xff] }
  0x2b   :  { %579 = vmatpush1.msra.mxu0 %v394_v39  ;;  %650 = vmatpush1.msra.mxu1 %v490_v40  ;;  %v368_v27 = vunpack.c.h.bf16 %v237_v19  ;;  %v464_v28 = vunpack.c.h.bf16 %v301_v20  ;;  %v367_v29 = vunpack.c.l.bf16 %v237_v19  ;;  %v463_v30 = vunpack.c.l.bf16 %v301_v20  ;;  %v359_v38 = vld [vmem:[#allocation5 + $0x2f4] sm:$0xff] }
  0x2c   :  { %580 = vmatprep.subr.mxu0 %v392_v43  ;;  %651 = vmatprep.subr.mxu1 %v488_v44  ;;  %v365_v33 = vunpack.c.h.bf16 %v235_v25  ;;  %v461_v34 = vunpack.c.h.bf16 %v299_v26  ;;  %v364_v35 = vunpack.c.l.bf16 %v235_v25  ;;  %v460_v36 = vunpack.c.l.bf16 %v299_v26  ;;  %v293_v43 = vld [vmem:[#allocation5 + $0x168] sm:$0xff] }
  0x2d   :  { %581 = vmatpush1.msra.mxu0 %v391_v45  ;;  %652 = vmatpush1.msra.mxu1 %v487_v46  ;;  %v362_v39 = vunpack.c.h.bf16 %v233_v31  ;;  %v458_v40 = vunpack.c.h.bf16 %v297_v32  ;;  %v361_v41 = vunpack.c.l.bf16 %v233_v31  ;;  %v457_v42 = vunpack.c.l.bf16 %v297_v32  ;;  %v357_v44 = vld [vmem:[#allocation5 + $0x2e8] sm:$0xff] }
  0x2e   :  { %582 = vmatprep.subr.mxu0 %v389_v49  ;;  %653 = vmatprep.subr.mxu1 %v485_v50  ;;  %v455_v45 = vunpack.c.h.bf16 %v295_v37  ;;  %v551_v46 = vunpack.c.h.bf16 %v359_v38  ;;  %v454_v47 = vunpack.c.l.bf16 %v295_v37  ;;  %v550_v48 = vunpack.c.l.bf16 %v359_v38  ;;  %v291_v49 = vld [vmem:[#allocation5 + $0x15c] sm:$0xff] }
  0x2f   :  { %583 = vmatpush1.msra.mxu0 %v388_v51  ;;  %654 = vmatpush1.msra.mxu1 %v484_v52  ;;  %v355_v50 = vld [vmem:[#allocation5 + $0x2dc] sm:$0xff]  ;;  %v452_v51 = vunpack.c.h.bf16 %v293_v43  ;;  %v548_v52 = vunpack.c.h.bf16 %v357_v44  ;;  %v451_v53 = vunpack.c.l.bf16 %v293_v43  ;;  %v547_v54 = vunpack.c.l.bf16 %v357_v44 }
  0x30   :  { %584 = vmatprep.subr.mxu0 %v386_v55  ;;  %655 = vmatprep.subr.mxu1 %v482_v56  ;;  %v289_v55 = vld [vmem:[#allocation5 + $0x150] sm:$0xff]  ;;  %v448_v59 = vunpack.c.l.bf16 %v291_v49  ;;  %v544_v60 = vunpack.c.l.bf16 %v355_v50  ;;  %vm902_vm1 = vcmask 7168  }
  0x31   :  { %585 = vmatpush1.msra.mxu0 %v385_v57  ;;  %656 = vmatpush1.msra.mxu1 %v481_v58  ;;  %v353_v56 = vld [vmem:[#allocation5 + $0x2d0] sm:$0xff]  ;;  %v449_v57 = vunpack.c.h.bf16 %v291_v49  ;;  %v545_v58 = vunpack.c.h.bf16 %v355_v50  ;;  %v445_v1 = vunpack.c.l.bf16 %v289_v55 }
  0x32   :  { %586 = vmatprep.subr.mxu0 %v383_v61  ;;  %657 = vmatprep.subr.mxu1 %v479_v62  ;;  %v287_v61 = vld [vmem:[#allocation5 + $0x144] sm:$0xff]  ;;  %v541_v2 = vunpack.c.l.bf16 %v353_v56 }
  0x33   :  { %587 = vmatpush1.msra.mxu0 %v382_v63  ;;  %658 = vmatpush1.msra.mxu1 %v478_v0  ;;  %v351_v62 = vld [vmem:[#allocation5 + $0x2c4] sm:$0xff]  ;;  %v446_v63 = vunpack.c.h.bf16 %v289_v55  ;;  %v542_v0 = vunpack.c.h.bf16 %v353_v56  ;;  %v442_v7 = vunpack.c.l.bf16 %v287_v61  ;;  %v269_v55 = vld [vmem:[#allocation5 + $0xd8] sm:$0xff] }
  0x34   :  { %588 = vmatprep.subr.mxu0 %v380_v3  ;;  %659 = vmatprep.subr.mxu1 %v476_v4  ;;  %v285_v3 = vld [vmem:[#allocation5 + $0x138] sm:$0xff]  ;;  %v538_v8 = vunpack.c.l.bf16 %v351_v62 }
  0x35   :  { %589 = vmatpush1.msra.mxu0 %v379_v5  ;;  %660 = vmatpush1.msra.mxu1 %v475_v6  ;;  %v349_v4 = vld [vmem:[#allocation5 + $0x2b8] sm:$0xff]  ;;  %v443_v5 = vunpack.c.h.bf16 %v287_v61  ;;  %v539_v6 = vunpack.c.h.bf16 %v351_v62  ;;  %v439_v13 = vunpack.c.l.bf16 %v285_v3  ;;  %v267_v61 = vld [vmem:[#allocation5 + $0xcc] sm:$0xff] }
  0x36   :  { %590 = vmatprep.subr.mxu0 %v377_v9  ;;  %661 = vmatprep.subr.mxu1 %v473_v10  ;;  %v283_v9 = vld [vmem:[#allocation5 + $0x12c] sm:$0xff]  ;;  %v535_v14 = vunpack.c.l.bf16 %v349_v4  ;;  %v333_v56 = vld [vmem:[#allocation5 + $0x258] sm:$0xff] }
  0x37   :  { %591 = vmatpush1.msra.mxu0 %v376_v11  ;;  %662 = vmatpush1.msra.mxu1 %v472_v12  ;;  %v347_v10 = vld [vmem:[#allocation5 + $0x2ac] sm:$0xff]  ;;  %v440_v11 = vunpack.c.h.bf16 %v285_v3  ;;  %v536_v12 = vunpack.c.h.bf16 %v349_v4  ;;  %v436_v19 = vunpack.c.l.bf16 %v283_v9  ;;  %v265_v3 = vld [vmem:[#allocation5 + $0xc0] sm:$0xff] }
  0x38   :  { %592 = vmatprep.subr.mxu0 %v374_v15  ;;  %663 = vmatprep.subr.mxu1 %v470_v16  ;;  %v281_v15 = vld [vmem:[#allocation5 + $0x120] sm:$0xff]  ;;  %v532_v20 = vunpack.c.l.bf16 %v347_v10  ;;  %v331_v62 = vld [vmem:[#allocation5 + $0x24c] sm:$0xff] }
  0x39   :  { %593 = vmatpush1.msra.mxu0 %v373_v17  ;;  %664 = vmatpush1.msra.mxu1 %v469_v18  ;;  %v345_v16 = vld [vmem:[#allocation5 + $0x2a0] sm:$0xff]  ;;  %v437_v17 = vunpack.c.h.bf16 %v283_v9  ;;  %v533_v18 = vunpack.c.h.bf16 %v347_v10  ;;  %v433_v25 = vunpack.c.l.bf16 %v281_v15  ;;  %v296_v9 = vld [vmem:[#allocation5 + $0x170] ss:$12 sps:$4 sm:$0xff]  }
  0x3a   :  { %594 = vmatprep.subr.mxu0 %v371_v21  ;;  %665 = vmatprep.subr.mxu1 %v467_v22  ;;  %v279_v21 = vld [vmem:[#allocation5 + $0x114] sm:$0xff]  ;;  %v529_v26 = vunpack.c.l.bf16 %v345_v16  ;;  %v329_v4 = vld [vmem:[#allocation5 + $0x240] sm:$0xff]  ;;  %v360_v10 = vld [vmem:[#allocation5 + $0x2f0] ss:$12 sps:$4 sm:$0xff]  }
  0x3b   :  { %595 = vmatpush1.msra.mxu0 %v370_v23  ;;  %666 = vmatpush1.msra.mxu1 %v466_v24  ;;  %v343_v22 = vld [vmem:[#allocation5 + $0x294] sm:$0xff]  ;;  %v434_v23 = vunpack.c.h.bf16 %v281_v15  ;;  %v530_v24 = vunpack.c.h.bf16 %v345_v16  ;;  %v430_v31 = vunpack.c.l.bf16 %v279_v21 }
  0x3c   :  { %596 = vmatprep.subr.mxu0 %v368_v27  ;;  %667 = vmatprep.subr.mxu1 %v464_v28  ;;  %v277_v27 = vld [vmem:[#allocation5 + $0x108] sm:$0xff]  ;;  %v526_v32 = vunpack.c.l.bf16 %v343_v22 }
  0x3d   :  { %597 = vmatpush1.msra.mxu0 %v367_v29  ;;  %668 = vmatpush1.msra.mxu1 %v463_v30  ;;  %v341_v28 = vld [vmem:[#allocation5 + $0x288] sm:$0xff]  ;;  %v431_v29 = vunpack.c.h.bf16 %v279_v21  ;;  %v527_v30 = vunpack.c.h.bf16 %v343_v22  ;;  %v427_v37 = vunpack.c.l.bf16 %v277_v27 }
  0x3e   :  { %598 = vmatprep.subr.mxu0 %v365_v33  ;;  %669 = vmatprep.subr.mxu1 %v461_v34  ;;  %v275_v33 = vld [vmem:[#allocation5 + $0xfc] sm:$0xff]  ;;  %v523_v38 = vunpack.c.l.bf16 %v341_v28 }
  0x3f   :  { %599 = vmatpush1.msra.mxu0 %v364_v35  ;;  %670 = vmatpush1.msra.mxu1 %v460_v36  ;;  %v339_v34 = vld [vmem:[#allocation5 + $0x27c] sm:$0xff]  ;;  %v428_v35 = vunpack.c.h.bf16 %v277_v27  ;;  %v524_v36 = vunpack.c.h.bf16 %v341_v28  ;;  %v424_v43 = vunpack.c.l.bf16 %v275_v33 }
  0x40   :  { %600 = vmatprep.subr.mxu0 %v362_v39  ;;  %671 = vmatprep.subr.mxu1 %v458_v40  ;;  %v273_v39 = vld [vmem:[#allocation5 + $0xf0] sm:$0xff]  ;;  %v520_v44 = vunpack.c.l.bf16 %v339_v34 }
  0x41   :  { %601 = vmatpush1.msra.mxu0 %v361_v41  ;;  %672 = vmatpush1.msra.mxu1 %v457_v42  ;;  %v337_v40 = vld [vmem:[#allocation5 + $0x270] sm:$0xff]  ;;  %v425_v41 = vunpack.c.h.bf16 %v275_v33  ;;  %v521_v42 = vunpack.c.h.bf16 %v339_v34  ;;  %v421_v49 = vunpack.c.l.bf16 %v273_v39 }
  0x42   :  { %602 = vmatprep.subr.mxu0 %v455_v45  ;;  %673 = vmatprep.subr.mxu1 %v551_v46  ;;  %v271_v45 = vld [vmem:[#allocation5 + $0xe4] sm:$0xff]  ;;  %v517_v50 = vunpack.c.l.bf16 %v337_v40 }
  0x43   :  { %603 = vmatpush2.msra.mxu0 %v454_v47  ;;  %674 = vmatpush2.msra.mxu1 %v550_v48  ;;  %v335_v46 = vld [vmem:[#allocation5 + $0x264] sm:$0xff]  ;;  %v422_v47 = vunpack.c.h.bf16 %v273_v39  ;;  %v518_v48 = vunpack.c.h.bf16 %v337_v40  ;;  %v453_v40 = vunpack.c.l.bf16 %v296_v9 }
  0x44   :  { %604 = vmatprep.subr.mxu0 %v452_v51  ;;  %675 = vmatprep.subr.mxu1 %v548_v52  ;;  %v419_v51 = vunpack.c.h.bf16 %v271_v45  ;;  %v515_v52 = vunpack.c.h.bf16 %v335_v46 }
  0x45   :  { %605 = vmatpush2.msra.mxu0 %v451_v53  ;;  %676 = vmatpush2.msra.mxu1 %v547_v54  ;;  %v418_v53 = vunpack.c.l.bf16 %v271_v45  ;;  %v514_v54 = vunpack.c.l.bf16 %v335_v46  ;;  %v324_v45 = vld [vmem:[#allocation5 + $0x218] ss:$12 sps:$4 sm:$0xff]  }
  0x46   :  { %606 = vmatprep.subr.mxu0 %v449_v57  ;;  %677 = vmatprep.subr.mxu1 %v545_v58  ;;  %v416_v57 = vunpack.c.h.bf16 %v269_v55  ;;  %v512_v58 = vunpack.c.h.bf16 %v333_v56 }
  0x47   :  { %607 = vmatpush2.msra.mxu0 %v448_v59  ;;  %678 = vmatpush2.msra.mxu1 %v544_v60  ;;  %v415_v59 = vunpack.c.l.bf16 %v269_v55  ;;  %v511_v60 = vunpack.c.l.bf16 %v333_v56  ;;  %v256_v56 = vld [vmem:[#allocation5 + $0x80] ss:$12 sps:$4 sm:$0xff]  }
  0x48   :  { %608 = vmatprep.subr.mxu0 %v446_v63  ;;  %679 = vmatprep.subr.mxu1 %v542_v0  ;;  %v413_v63 = vunpack.c.h.bf16 %v267_v61  ;;  %v509_v0 = vunpack.c.h.bf16 %v331_v62 }
  0x49   :  { %609 = vmatpush2.msra.mxu0 %v445_v1  ;;  %680 = vmatpush2.msra.mxu1 %v541_v2  ;;  %v412_v1 = vunpack.c.l.bf16 %v267_v61  ;;  %v508_v2 = vunpack.c.l.bf16 %v331_v62  ;;  %v396_v62 = vunpack.c.h.bf16 %v256_v56 }
  0x4a   :  { %610 = vmatprep.subr.mxu0 %v443_v5  ;;  %681 = vmatprep.subr.mxu1 %v539_v6  ;;  %v410_v5 = vunpack.c.h.bf16 %v265_v3  ;;  %v506_v6 = vunpack.c.h.bf16 %v329_v4 }
  0x4b   :  { %611 = vmatpush2.msra.mxu0 %v442_v7  ;;  %682 = vmatpush2.msra.mxu1 %v538_v8  ;;  %v409_v7 = vunpack.c.l.bf16 %v265_v3  ;;  %v505_v8 = vunpack.c.l.bf16 %v329_v4  ;;  %v252_v4 = vld [vmem:[#allocation5 + $0x68] ss:$12 sps:$4 sm:$0xff]  }
  0x4c   :  { %612 = vmatprep.subr.mxu0 %v440_v11  ;;  %683 = vmatprep.subr.mxu1 %v536_v12  ;;  %v456_v11 = vunpack.c.h.bf16 %v296_v9  ;;  %v552_v12 = vunpack.c.h.bf16 %v360_v10 }
  0x4d   :  { %613 = vmatpush2.msra.mxu0 %v439_v13  ;;  %684 = vmatpush2.msra.mxu1 %v535_v14  ;;  %v63_v13 = vlaneseq }
  0x4e   :  { %614 = vmatprep.subr.mxu0 %v437_v17  ;;  %685 = vmatprep.subr.mxu1 %v533_v18  ;;  %v61_v17 = vld [vmem:[%s1143_s2] sm:$0xf] }
  0x4f   :  { %615 = vmatpush2.msra.mxu0 %v436_v19  ;;  %686 = vmatpush2.msra.mxu1 %v532_v20  ;;  %v1091_v14 = vshrl.u32 %v63_v13, 7  ;;  %v344_v13 = vld [vmem:[#allocation5 + $0x290] ss:$12 sps:$4 sm:$0xff]  }
  0x50   :  { %616 = vmatprep.subr.mxu0 %v434_v23  ;;  %687 = vmatprep.subr.mxu1 %v530_v24 }
  0x51   :  { %617 = vmatpush2.msra.mxu0 %v433_v25  ;;  %688 = vmatpush2.msra.mxu1 %v529_v26  ;;  %v1094_v15 = vsub.s32 2, %v1091_v14  ;;  %v1097_v16 = vsub.s32 0, %v1091_v14  ;;  %v69_v18 = vsub.s32 1, %v1091_v14  ;;  %v77_v19 = vsub.s32 3, %v1091_v14 }
  0x52   :  { %618 = vmatprep.subr.mxu0 %v431_v29  ;;  %689 = vmatprep.subr.mxu1 %v527_v30  ;;  %v264_v30 = vld [vmem:[#allocation5 + $0xb0] ss:$12 sps:$4 sm:$0xff]  }
  0x53   :  { %619 = vmatpush2.msra.mxu0 %v430_v31  ;;  %690 = vmatpush2.msra.mxu1 %v526_v32  ;;  %v74_v20 = vrot.slane %v61_v17, %v1094_v15  ;;  %v66_v21 = vrot.slane %v61_v17, %v1097_v16  ;;  %v70_v22 = vrot.slane %v61_v17, %v69_v18  ;;  %v328_v31 = vld [vmem:[#allocation5 + $0x230] ss:$12 sps:$4 sm:$0xff]   ;;  %v405_v46 = vunpack.c.l.bf16 %v264_v30 }
  0x54   :  { %620 = vmatprep.subr.mxu0 %v428_v35  ;;  %691 = vmatprep.subr.mxu1 %v524_v36  ;;  %v78_v23 = vrot.slane %v61_v17, %v77_v19 }
  0x55   :  { %621 = vmatpush2.msra.mxu0 %v427_v37  ;;  %692 = vmatpush2.msra.mxu1 %v523_v38  ;;  %v408_v37 = vunpack.c.h.bf16 %v264_v30  ;;  %v504_v38 = vunpack.c.h.bf16 %v328_v31  ;;  %v276_v30 = vld [vmem:[#allocation5 + $0xf8] ss:$12 sps:$4 sm:$0xff]  }
  0x56   :  { %622 = vmatprep.subr.mxu0 %v425_v41  ;;  %693 = vmatprep.subr.mxu1 %v521_v42  ;;  %v292_v41 = vld [vmem:[#allocation5 + $0x158] ss:$12 sps:$4 sm:$0xff]  }
  0x57   :  { %623 = vmatpush2.msra.mxu0 %v424_v43  ;;  %694 = vmatpush2.msra.mxu1 %v520_v44  ;;  %v356_v42 = vld [vmem:[#allocation5 + $0x2d8] ss:$12 sps:$4 sm:$0xff]   ;;  %v549_v43 = vunpack.c.l.bf16 %v360_v10  ;;  %v390_v10 = vunpack.c.h.bf16 %v252_v4 }
  0x58   :  { %624 = vmatprep.subr.mxu0 %v422_v47  ;;  %695 = vmatprep.subr.mxu1 %v518_v48  ;;  %v260_v44 = vld [vmem:[#allocation5 + $0x98] ss:$12 sps:$4 sm:$0xff]   ;;  %v501_v47 = vunpack.c.l.bf16 %v328_v31  ;;  %v450_v48 = vunpack.c.h.bf16 %v292_v41  ;;  %v543_v55 = vunpack.c.l.bf16 %v356_v42 }
  0x59   :  { %625 = vmatpush2.msra.mxu0 %v421_v49  ;;  %696 = vmatpush2.msra.mxu1 %v517_v50  ;;  %v546_v49 = vunpack.c.h.bf16 %v356_v42  ;;  %v402_v50 = vunpack.c.h.bf16 %v260_v44  ;;  %v340_v31 = vld [vmem:[#allocation5 + $0x278] ss:$12 sps:$4 sm:$0xff]  }
  0x5a   :  { %626 = vmatprep.subr.mxu0 %v419_v51  ;;  %697 = vmatprep.subr.mxu1 %v515_v52  ;;  %v498_v51 = vunpack.c.h.bf16 %v324_v45  ;;  %v288_v52 = vld [vmem:[#allocation5 + $0x140] ss:$12 sps:$4 sm:$0xff]  }
  0x5b   :  { %627 = vmatpush2.msra.mxu0 %v418_v53  ;;  %698 = vmatpush2.msra.mxu1 %v514_v54  ;;  %v352_v53 = vld [vmem:[#allocation5 + $0x2c0] ss:$12 sps:$4 sm:$0xff]   ;;  %v447_v54 = vunpack.c.l.bf16 %v292_v41  ;;  %v522_v41 = vunpack.c.h.bf16 %v340_v31 }
  0x5c   :  { %628 = vmatprep.subr.mxu0 %v416_v57  ;;  %699 = vmatprep.subr.mxu1 %v512_v58  ;;  %v320_v57 = vld [vmem:[#allocation5 + $0x200] ss:$12 sps:$4 sm:$0xff]   ;;  %v399_v58 = vunpack.c.l.bf16 %v260_v44  ;;  %v540_v61 = vunpack.c.h.bf16 %v352_v53  ;;  %v537_v3 = vunpack.c.l.bf16 %v352_v53 }
  0x5d   :  { %629 = vmatpush2.msra.mxu0 %v415_v59  ;;  %700 = vmatpush2.msra.mxu1 %v511_v60  ;;  %v495_v59 = vunpack.c.l.bf16 %v324_v45  ;;  %v444_v60 = vunpack.c.h.bf16 %v288_v52  ;;  %v272_v44 = vld [vmem:[#allocation5 + $0xe0] ss:$12 sps:$4 sm:$0xff]  }
  0x5e   :  { %630 = vmatprep.subr.mxu0 %v413_v63  ;;  %701 = vmatprep.subr.mxu1 %v509_v0  ;;  %v492_v63 = vunpack.c.h.bf16 %v320_v57  ;;  %v284_v0 = vld [vmem:[#allocation5 + $0x128] ss:$12 sps:$4 sm:$0xff]   ;;  %v336_v45 = vld [vmem:[#allocation5 + $0x260] ss:$12 sps:$4 sm:$0xff]  }
  0x5f   :  { %631 = vmatpush2.msra.mxu0 %v412_v1  ;;  %702 = vmatpush2.msra.mxu1 %v508_v2  ;;  %v348_v1 = vld [vmem:[#allocation5 + $0x2a8] ss:$12 sps:$4 sm:$0xff]   ;;  %v441_v2 = vunpack.c.l.bf16 %v288_v52  ;;  %v435_v17 = vunpack.c.l.bf16 %v284_v0  ;;  %v420_v52 = vunpack.c.h.bf16 %v272_v44  ;;  %v516_v53 = vunpack.c.h.bf16 %v336_v45 }
  0x60   :  { %632 = vmatprep.subr.mxu0 %v410_v5  ;;  %703 = vmatprep.subr.mxu1 %v506_v6  ;;  %v316_v5 = vld [vmem:[#allocation5 + $0x1e8] ss:$12 sps:$4 sm:$0xff]   ;;  %v393_v6 = vunpack.c.l.bf16 %v256_v56  ;;  %v534_v9 = vunpack.c.h.bf16 %v348_v1  ;;  %v531_v19 = vunpack.c.l.bf16 %v348_v1 }
  0x61   :  { %633 = vmatpush2.msra.mxu0 %v409_v7  ;;  %704 = vmatpush2.msra.mxu1 %v505_v8  ;;  %v489_v7 = vunpack.c.l.bf16 %v320_v57  ;;  %v438_v8 = vunpack.c.h.bf16 %v284_v0  ;;  %v268_v56 = vld [vmem:[#allocation5 + $0xc8] ss:$12 sps:$4 sm:$0xff]  }
  0x62   :  { %913 = vmatprep.subr.mxu0 %v456_v11  ;;  %948 = vmatprep.subr.mxu1 %v552_v12  ;;  %v486_v11 = vunpack.c.h.bf16 %v316_v5  ;;  %v280_v12 = vld [vmem:[#allocation5 + $0x110] ss:$12 sps:$4 sm:$0xff]   ;;  %v332_v57 = vld [vmem:[#allocation5 + $0x248] ss:$12 sps:$4 sm:$0xff]   ;;  %v414_v0 = vunpack.c.h.bf16 %v268_v56 }
  0x63   :  { %v510_v1 = vunpack.c.h.bf16 %v332_v57 }
  0xe1   :  { %v153_v24 = vpop.f32.mrf.mxu0  ;;  %v224_v25 = vpop.f32.mrf.mxu1 }
  0xe2   :  { %v1108_v26 = vadd.f32 %v224_v25, %v74_v20  ;;  %v1110_v27 = vadd.f32 %v153_v24, %v66_v21  ;;  %v248_v20 = vld [vmem:[#allocation5 + $0x50] ss:$12 sps:$4 sm:$0xff]   ;;  %v432_v24 = vunpack.c.h.bf16 %v280_v12  ;;  %v528_v25 = vunpack.c.h.bf16 %v344_v13 }
  0xe3   :  { %v155_v28 = vpop.f32.mrf.mxu0  ;;  %v226_v29 = vpop.f32.mrf.mxu1  ;;  %v312_v21 = vld [vmem:[#allocation5 + $0x1d0] ss:$12 sps:$4 sm:$0xff]  }
  0xe4   :  { %v156_v32 = vadd.f32 %v155_v28, %v70_v22  ;;  %v227_v33 = vadd.f32 %v226_v29, %v78_v23  ;;  %v231_v34 = vmax.f32 %v1108_v26, 0.0  ;;  %v229_v39 = vmax.f32 %v1110_v27, 0.0  ;;  %v855_v27 = vld [vmem:[%s1146_s5] sm:$0x7] }
  0xe5   :  { %v387_v22 = vunpack.c.l.bf16 %v252_v4  ;;  %v483_v23 = vunpack.c.l.bf16 %v316_v5  ;;  %v384_v28 = vunpack.c.h.bf16 %v248_v20  ;;  %v480_v29 = vunpack.c.h.bf16 %v312_v21 }
  0xe6   :  { %v230_v35 = vmax.f32 %v156_v32, 0.0  ;;  %v232_v36 = vmax.f32 %v227_v33, 0.0  ;;  %v429_v32 = vunpack.c.l.bf16 %v280_v12  ;;  %v525_v33 = vunpack.c.l.bf16 %v344_v13 }
  0xe7   :  { %v411_v4 = vunpack.c.l.bf16 %v268_v56  ;;  %v507_v5 = vunpack.c.l.bf16 %v332_v57  ;;  %v856_v26 = vunpack.c.l.bf16 %v855_v27 }
  0xe8   :  { %634 = vmatprep.mubr.f32.mxu0 %v230_v35  ;;  %705 = vmatprep.mubr.f32.mxu1 %v232_v36 }
  0xe9   :  { %635 = vmatmul.mubr.f32.vlgmr.msra.gmra.mxu0 %v229_v39  ;;  %706 = vmatmul.mubr.f32.vlgmr.msra.gmra.mxu1 %v231_v34 }
  0xea   :  { %914 = vmatpush3.msra.mxu0 %v408_v37  ;;  %949 = vmatpush3.msra.mxu1 %v504_v38  ;;  %v381_v37 = vunpack.c.l.bf16 %v248_v20  ;;  %v477_v38 = vunpack.c.l.bf16 %v312_v21  ;;  %v865_v20 = vrot.slane %v856_v26, %v1094_v15  ;;  %v868_v21 = vsub.s32 4, %v1091_v14 }
  0xeb   :  { %915 = vmatprep.subr.mxu0 %v453_v40  ;;  %776 = vmatprep.mubr.f32.mxu0 %v230_v35  ;;  %v244_v35 = vld [vmem:[#allocation5 + $0x38] ss:$12 sps:$4 sm:$0xff]   ;;  %v426_v40 = vunpack.c.h.bf16 %v276_v30 }
  0xec   :  { %950 = vmatprep.subr.mxu1 %v549_v43  ;;  %846 = vmatprep.mubr.f32.mxu1 %v232_v36  ;;  %v308_v36 = vld [vmem:[#allocation5 + $0x1b8] ss:$12 sps:$4 sm:$0xff]   ;;  %v378_v42 = vunpack.c.h.bf16 %v244_v35 }
  0xed   :  { %916 = vmatpush3.msra.mxu0 %v405_v46  ;;  %951 = vmatpush3.msra.mxu1 %v501_v47  ;;  %v474_v43 = vunpack.c.h.bf16 %v308_v36  ;;  %v423_v46 = vunpack.c.l.bf16 %v276_v30  ;;  %v519_v47 = vunpack.c.l.bf16 %v340_v31  ;;  %v880_v31 = vrot.slane %v865_v20, %v1097_v16 }
  0xee   :  { %917 = vmatprep.subr.mxu0 %v450_v48  ;;  %952 = vmatprep.subr.mxu1 %v546_v49  ;;  %v240_v48 = vld [vmem:[#allocation5 + $0x20] ss:$12 sps:$4 sm:$0xff]  }
  0xef   :  { %918 = vmatpush3.msra.mxu0 %v402_v50  ;;  %953 = vmatpush3.msra.mxu1 %v498_v51  ;;  %v304_v49 = vld [vmem:[#allocation5 + $0x1a0] ss:$12 sps:$4 sm:$0xff]   ;;  %v375_v50 = vunpack.c.l.bf16 %v244_v35  ;;  %v471_v51 = vunpack.c.l.bf16 %v308_v36 }
  0xf0   :  { %919 = vmatprep.subr.mxu0 %v447_v54  ;;  %954 = vmatprep.subr.mxu1 %v543_v55  ;;  %v372_v54 = vunpack.c.h.bf16 %v240_v48  ;;  %v468_v55 = vunpack.c.h.bf16 %v304_v49 }
  0xf1   :  { %920 = vmatpush3.msra.mxu0 %v399_v58  ;;  %955 = vmatpush3.msra.mxu1 %v495_v59  ;;  %v417_v58 = vunpack.c.l.bf16 %v272_v44  ;;  %v513_v59 = vunpack.c.l.bf16 %v336_v45 }
  0xf2   :  { %921 = vmatprep.subr.mxu0 %v444_v60  ;;  %956 = vmatprep.subr.mxu1 %v540_v61  ;;  %v236_v60 = vld [vmem:[#allocation5 + $0x8] ss:$12 sps:$4 sm:$0xff]  }
  0xf3   :  { %922 = vmatpush3.msra.mxu0 %v396_v62  ;;  %957 = vmatpush3.msra.mxu1 %v492_v63  ;;  %v300_v61 = vld [vmem:[#allocation5 + $0x188] ss:$12 sps:$4 sm:$0xff]   ;;  %v369_v62 = vunpack.c.l.bf16 %v240_v48  ;;  %v465_v63 = vunpack.c.l.bf16 %v304_v49 }
  0xf4   :  { %923 = vmatprep.subr.mxu0 %v441_v2  ;;  %958 = vmatprep.subr.mxu1 %v537_v3  ;;  %v366_v2 = vunpack.c.h.bf16 %v236_v60  ;;  %v462_v3 = vunpack.c.h.bf16 %v300_v61 }
  0xf5   :  { %924 = vmatpush3.msra.mxu0 %v393_v6  ;;  %959 = vmatpush3.msra.mxu1 %v489_v7  ;;  %v363_v6 = vunpack.c.l.bf16 %v236_v60  ;;  %v459_v7 = vunpack.c.l.bf16 %v300_v61 }
  0xf6   :  { %925 = vmatprep.subr.mxu0 %v438_v8  ;;  %960 = vmatprep.subr.mxu1 %v534_v9  ;;  %v553_v9 = vld [vmem:[%s1145_s4] sm:$0x7] }
  0xf7   :  { %926 = vmatpush3.msra.mxu0 %v390_v10  ;;  %961 = vmatpush3.msra.mxu1 %v486_v11  ;;  %v562_v10 = vrot.slane %v553_v9, %v69_v18  ;;  %v558_v12 = vrot.slane %v553_v9, %v1097_v16 }
  0xf8   :  { %927 = vmatprep.subr.mxu0 %v435_v17  ;;  %962 = vmatprep.subr.mxu1 %v531_v19 }
  0xf9   :  { %928 = vmatpush3.msra.mxu0 %v387_v22  ;;  %963 = vmatpush3.msra.mxu1 %v483_v23 }
  0xfa   :  { %929 = vmatprep.subr.mxu0 %v432_v24  ;;  %964 = vmatprep.subr.mxu1 %v528_v25  ;;  %v861_v24 = vrot.slane %v856_v26, %v1097_v16  ;;  %v566_v25 = vrot.slane %v553_v9, %v1094_v15 }
  0xfb   :  { %930 = vmatpush3.msra.mxu0 %v384_v28  ;;  %965 = vmatpush3.msra.mxu1 %v480_v29 }
  0xfc   :  { %931 = vmatprep.subr.mxu0 %v429_v32  ;;  %966 = vmatprep.subr.mxu1 %v525_v33  ;;  %v869_v33 = vrot.slane %v856_v26, %v868_v21  ;;  %v876_v36 = vrot.slane %v861_v24, %v1097_v16 }
  0xfd   :  { %932 = vmatpush3.msra.mxu0 %v381_v37  ;;  %967 = vmatpush3.msra.mxu1 %v477_v38 }
  0xfe   :  { %933 = vmatprep.subr.mxu0 %v426_v40  ;;  %968 = vmatprep.subr.mxu1 %v522_v41  ;;  %v884_v41 = vrot.slane %v869_v33, %v1097_v16 }
  0xff   :  { %934 = vmatpush3.msra.mxu0 %v378_v42  ;;  %969 = vmatpush3.msra.mxu1 %v474_v43 }
 0x100   :  { %935 = vmatprep.subr.mxu0 %v423_v46  ;;  %970 = vmatprep.subr.mxu1 %v519_v47  ;;  %v912_v46 = vld [vmem:[#allocation2] ss:$0 sm:$0xff] }
 0x101   :  { %936 = vmatpush3.msra.mxu0 %v375_v50  ;;  %971 = vmatpush3.msra.mxu1 %v471_v51 }
 0x102   :  { %937 = vmatprep.subr.mxu0 %v420_v52  ;;  %972 = vmatprep.subr.mxu1 %v516_v53 }
 0x103   :  { %938 = vmatpush3.msra.mxu0 %v372_v54  ;;  %973 = vmatpush3.msra.mxu1 %v468_v55 }
 0x104   :  { %939 = vmatprep.subr.mxu0 %v417_v58  ;;  %974 = vmatprep.subr.mxu1 %v513_v59 }
 0x105   :  { %940 = vmatpush3.msra.mxu0 %v369_v62  ;;  %975 = vmatpush3.msra.mxu1 %v465_v63 }
 0x106   :  { %941 = vmatprep.subr.mxu0 %v414_v0  ;;  %976 = vmatprep.subr.mxu1 %v510_v1 }
 0x107   :  { %942 = vmatpush3.msra.mxu0 %v366_v2  ;;  %977 = vmatpush3.msra.mxu1 %v462_v3 }
 0x108   :  { %943 = vmatprep.subr.mxu0 %v411_v4  ;;  %978 = vmatprep.subr.mxu1 %v507_v5 }
 0x109   :  { %944 = vmatpush3.msra.mxu0 %v363_v6  ;;  %979 = vmatpush3.msra.mxu1 %v459_v7 }
 0x10a   :  { %777 = vmatmul.mubr.f32.vlgmr.msra.gmra.mxu0 %v229_v39  ;;  %847 = vmatmul.mubr.f32.vlgmr.msra.gmra.mxu1 %v231_v34 }
 0x1a9   :  { %v636_v8 = vpop.f32.mrf.mxu0  ;;  %v707_v13 = vpop.f32.mrf.mxu1 }
 0x1aa   :  { %v637_v17 = vadd.f32 %v636_v8, %v558_v12 }
 0x1ab   :  { %v638_v11 = vpop.f32.mrf.mxu0  ;;  %v709_v34 = vpop.f32.mrf.mxu1 }
 0x1ac   :  { %v639_v39 = vadd.f32 %v638_v11, %v562_v10  ;;  %v708_v18 = vadd.f32 %v707_v13, %v637_v17 }
 0x1ae   :  { %v710_v19 = vadd.f32 %v709_v34, %v639_v39  ;;  %v852_v35 = vmax.f32 %v708_v18, 0.0 }
 0x1b0   :  { %v853_v30 = vmax.f32 %v710_v19, 0.0  ;;  %v885_v42 = vmul.f32 %v876_v36, %v852_v35 }
 0x1b2   :  { %v886_v14 = vmul.f32 %v880_v31, %v853_v30 }
 0x1b4   :  { %v888_v15 = vadd.f32 %v886_v14, %v885_v42 }
 0x1ca   :  { %v945_v22 = vpop.f32.mrf.mxu0  ;;  %v980_v23 = vpop.f32.mrf.mxu1 }
 0x1cc   :  { %v946_v28 = vpop.f32.mrf.mxu0  ;;  %v981_v29 = vpop.f32.mrf.mxu1 }
 0x1cd   :  { %v947_v32 = vadd.f32 %v946_v28, %v945_v22  ;;  %v982_v38 = vadd.f32 %v981_v29, %v980_v23 }
 0x1cf   :  { %v779_v37 = vadd.f32 %v947_v32, %v566_v25 }
 0x1d1   :  { %v849_v40 = vadd.f32 %v982_v38, %v779_v37 }
 0x1d3   :  { %v854_v43 = vmax.f32 %v849_v40, 0.0 }
 0x1d5   :  { %v887_v44 = vmul.f32 %v884_v41, %v854_v43 }
 0x1d7   :  { %v889_v45 = vadd.f32 %v888_v15, %v887_v44 }
 0x1d9   :  { %890 = vadd.xlane.f32.xlu0 %v889_v45 }
 0x262   :  { %v891_v47 = vpop.xlane.xlu0 %890 }
 0x263   :  { %v899_v48 = vadd.f32 %v912_v46, %v891_v47 }
 0x265   :  { %988 = vtanh.f32 %v899_v48 }
 0x272   :  { %v989_v49 = vpop.eup %988 }
 0x273   :  { %v901_v50 = vmul.f32 2.0, %v989_v49 }
 0x275   :  { %903 = vst.msk [vmem:[%s1148_s7] sm:$0xff] %vm902_vm1, %v901_v50 }
 0x276   :  { %908 = vsyncpa [#allocation4], 1 }
 0x277   :  { %909 = vsyncpa [#allocation6], 1 }

</bundles_post_ra>
